<compile_context>
chip_gen: v5e
topology: v5e:2x2
jax: 0.10.0
libtpu: 0.0.40
codegen_flags: <defaults>
</compile_context>

<pallas_src>
import functools

import jax
import jax.numpy as jnp
from jax import lax
from jax.experimental import pallas as pl
from jax.experimental.pallas import tpu as pltpu

EPS = 1e-5
LANES = 128


def _round_up(n, m):
    return (n + m - 1) // m * m


def _mlp_bn_kernel(x_ref, w_ref, o_ref, *, dims, offs):
    in_size, h1, h2 = dims
    o1, o2, o3, op = offs

    def bn(h, gamma, beta):
        # Training-mode BatchNorm1d with a shortened dependent chain:
        # two independent sublane reductions, then one fused scale/shift.
        mean = jnp.mean(h, axis=0, keepdims=True)
        mean_sq = jnp.mean(h * h, axis=0, keepdims=True)
        var = jnp.maximum(mean_sq - mean * mean, 0.0)
        scale = gamma * lax.rsqrt(var + EPS)
        shift = beta - mean * scale
        return h * scale + shift

    x = x_ref[...]                                    # (B, in_size)

    # Static slices of the single packed slab (zero runtime indexing cost).
    w1 = w_ref[o1:o1 + in_size, 0:h1]                 # (in, h1)
    w2 = w_ref[o2:o2 + h1, 0:h2]                      # (h1, h2)
    w3r = w_ref[o3:o3 + 1, 0:h2]                      # (1, h2), w3 stored transposed

    b1 = w_ref[op + 0:op + 1, 0:h1]
    g1 = w_ref[op + 1:op + 2, 0:h1]
    be1 = w_ref[op + 2:op + 3, 0:h1]
    b2 = w_ref[op + 3:op + 4, 0:h2]
    g2 = w_ref[op + 4:op + 5, 0:h2]
    be2 = w_ref[op + 5:op + 6, 0:h2]
    b3 = w_ref[op + 6:op + 7, 0:1]
    g3 = w_ref[op + 7:op + 8, 0:1]
    be3 = w_ref[op + 8:op + 9, 0:1]

    # Layer 1: Linear(input_size -> h1) + ReLU + BN1d(h1)
    a1 = jnp.maximum(jnp.dot(x, w1, preferred_element_type=jnp.float32) + b1, 0.0)
    a1 = bn(a1, g1, be1)

    # Layer 2: Linear(h1 -> h2) + ReLU + BN1d(h2)
    a2 = jnp.maximum(jnp.dot(a1, w2, preferred_element_type=jnp.float32) + b2, 0.0)
    a2 = bn(a2, g2, be2)

    # Layer 3: Linear(h2 -> 1) + ReLU + BN1d(1).  N=1 matmul done as a
    # VPU multiply + lane reduce (cheaper than an MXU push/pop here).
    z3 = jnp.sum(a2 * w3r, axis=-1, keepdims=True) + b3
    a3 = bn(jnp.maximum(z3, 0.0), g3, be3)

    o_ref[...] = a3.astype(o_ref.dtype)


def two_layer_network_forward(x, slab, *, input_size, hidden, offs):
    """x: (B, input_size) for a single forward call, or (N, B, input_size)
    for a stack of N independent forward calls (each call's BatchNorm uses its
    own batch statistics).  Returns (B,) or (N, B) float32, matching
    `self._model(vector).flatten()` per call."""
    single = (x.ndim == 2)
    if single:
        x = x[None]
    N, B, _ = x.shape
    h1, h2 = hidden
    kernel = functools.partial(
        _mlp_bn_kernel, dims=(input_size, h1, h2), offs=offs)

    cost = pl.CostEstimate(
        flops=7000 * N,
        transcendentals=(h1 + h2 + 1) * N,
        bytes_accessed=x.size * 4 + slab.size * 4 + N * B * 4,
    )

    out = pl.pallas_call(
        kernel,
        grid=(N,),
        out_shape=jax.ShapeDtypeStruct((N, B, 1), jnp.float32),
        in_specs=[
            # One forward call's batch per grid step.
            pl.BlockSpec((None, B, input_size), lambda i: (i, 0, 0)),
            # Parameter slab: constant block index -> DMA'd once, VMEM-resident.
            pl.BlockSpec(slab.shape, lambda i: (0, 0)),
        ],
        out_specs=pl.BlockSpec((None, B, 1), lambda i: (i, 0, 0)),
        compiler_params=pltpu.CompilerParams(
            dimension_semantics=("parallel",)),
        cost_estimate=cost,
    )(x, slab)

    out = out.reshape(N, B)
    return out[0] if single else out


def init_params(key, input_size, hidden=(10, 20)):
    h1, h2 = hidden
    ks = jax.random.split(key, 12)
    # Linear weights stored pre-transposed as (in, out); 1-D biases / BN affines.
    return {
        "w1": jax.random.normal(ks[0], (input_size, h1), jnp.float32) * 0.1,
        "b1": jax.random.normal(ks[1], (h1,), jnp.float32) * 0.05,
        "g1": 1.0 + jax.random.normal(ks[2], (h1,), jnp.float32) * 0.05,
        "be1": jax.random.normal(ks[3], (h1,), jnp.float32) * 0.05,
        "w2": jax.random.normal(ks[4], (h1, h2), jnp.float32) * 0.1,
        "b2": jax.random.normal(ks[5], (h2,), jnp.float32) * 0.05,
        "g2": 1.0 + jax.random.normal(ks[6], (h2,), jnp.float32) * 0.05,
        "be2": jax.random.normal(ks[7], (h2,), jnp.float32) * 0.05,
        "w3": jax.random.normal(ks[8], (h2, 1), jnp.float32) * 0.1,
        "b3": jax.random.normal(ks[9], (1,), jnp.float32) * 0.05,
        "g3": 1.0 + jax.random.normal(ks[10], (1,), jnp.float32) * 0.05,
        "be3": jax.random.normal(ks[11], (1,), jnp.float32) * 0.05,
    }


def pack_params(params, input_size, hidden=(10, 20)):
    """Pack all 12 parameter tensors into ONE (rows, 128) slab (done once,
    outside the kernel).  Row offsets are 8-aligned so in-kernel static slices
    stay within tile rules; lanes padded to 128 for dense transfers."""
    h1, h2 = hidden
    o1 = 0
    o2 = _round_up(o1 + input_size, 8)
    o3 = _round_up(o2 + h1, 8)
    op = _round_up(o3 + 1, 8)
    rows = _round_up(op + 9, 8)

    slab = jnp.zeros((rows, LANES), jnp.float32)
    slab = slab.at[o1:o1 + input_size, 0:h1].set(params["w1"])
    slab = slab.at[o2:o2 + h1, 0:h2].set(params["w2"])
    slab = slab.at[o3, 0:h2].set(params["w3"][:, 0])      # stored as a row
    slab = slab.at[op + 0, 0:h1].set(params["b1"])
    slab = slab.at[op + 1, 0:h1].set(params["g1"])
    slab = slab.at[op + 2, 0:h1].set(params["be1"])
    slab = slab.at[op + 3, 0:h2].set(params["b2"])
    slab = slab.at[op + 4, 0:h2].set(params["g2"])
    slab = slab.at[op + 5, 0:h2].set(params["be2"])
    slab = slab.at[op + 6, 0:1].set(params["b3"])
    slab = slab.at[op + 7, 0:1].set(params["g3"])
    slab = slab.at[op + 8, 0:1].set(params["be3"])
    return slab, (o1, o2, o3, op)


def _reference_forward(x, p):
    """Pure-JAX reference for ONE forward call (two-pass BN, like PyTorch)."""
    def bn(h, g, b):
        m = jnp.mean(h, axis=0, keepdims=True)
        v = jnp.mean((h - m) ** 2, axis=0, keepdims=True)
        return (h - m) / jnp.sqrt(v + EPS) * g + b

    h = jnp.maximum(x @ p["w1"] + p["b1"], 0.0)
    h = bn(h, p["g1"], p["be1"])
    h = jnp.maximum(h @ p["w2"] + p["b2"], 0.0)
    h = bn(h, p["g2"], p["be2"])
    h = jnp.maximum(h @ p["w3"] + p["b3"], 0.0)
    h = bn(h, p["g3"], p["be3"])
    return h.reshape(-1)


if __name__ == "__main__":
    key = jax.random.PRNGKey(0)
    k_x, k_p = jax.random.split(key)

    # N_CALLS independent forward calls, each on a batch of B vectors
    # (batch > 1 needed for training-mode BatchNorm1d).
    N_CALLS, B, INPUT_SIZE, HIDDEN = 4, 8, 16, (10, 20)
    x = jax.random.normal(k_x, (N_CALLS, B, INPUT_SIZE), jnp.float32)
    params = init_params(k_p, INPUT_SIZE, HIDDEN)
    slab, offs = pack_params(params, INPUT_SIZE, HIDDEN)

    # Batched-grid path (params stay VMEM-resident across grid steps).
    y = two_layer_network_forward(
        x, slab, input_size=INPUT_SIZE, hidden=HIDDEN, offs=offs)
    y = jax.block_until_ready(y)

    y_ref = jax.vmap(lambda xb: _reference_forward(xb, params))(x)
    assert y.shape == (N_CALLS, B)
    assert jnp.allclose(y, y_ref, atol=5e-4, rtol=5e-4), (y, y_ref)

    # Single-call path (matches the original module's forward signature).
    y1 = two_layer_network_forward(
        x[0], slab, input_size=INPUT_SIZE, hidden=HIDDEN, offs=offs)
    y1 = jax.block_until_ready(y1)
    assert y1.shape == (B,)
    assert jnp.allclose(y1, y_ref[0], atol=5e-4, rtol=5e-4), (y1, y_ref[0])

    # TODO(synk): BatchNorm running_mean/running_var updates (training-step
    # side effect) and l1_reg/l2_reg parameter-norm scalars are not part of
    # forward(); compute them in plain JAX if ever needed.
    print("KERNEL_OK")
</pallas_src>

<mosaic_0001>
module attributes {stable_mosaic.version = 11 : i64} {
  func.func @_mlp_bn_kernel(%arg0: i32, %arg1: memref<1x8x16xf32, #tpu.memory_space<vmem>>, %arg2: memref<56x128xf32, #tpu.memory_space<vmem>>, %arg3: memref<1x8x1xf32, #tpu.memory_space<vmem>>) attributes {dimension_semantics = [#tpu.dimension_semantics<parallel>], iteration_bounds = array<i64: 4>, scalar_prefetch = 0 : i64, scratch_operands = 0 : i64, tpu.core_type = #tpu.core_type<tc>, window_params = [{transform_indices = @transform_0, window_bounds = array<i64: 1, 8, 16>}, {pipeline_mode = #tpu.pipeline_mode<synchronous>, transform_indices = @transform_1, window_bounds = array<i64: 56, 128>}, {transform_indices = @transform_2, window_bounds = array<i64: 1, 8, 1>}]} {
    %c0 = arith.constant 0 : index
    %c0_0 = arith.constant 0 : index
    %c0_1 = arith.constant 0 : index
    %0 = vector.load %arg1[%c0, %c0_0, %c0_1] : memref<1x8x16xf32, #tpu.memory_space<vmem>>, vector<1x8x16xf32>
    %1 = vector.shape_cast %0 : vector<1x8x16xf32> to vector<8x16xf32>
    %c0_2 = arith.constant 0 : index
    %c0_3 = arith.constant 0 : index
    %2 = vector.load %arg2[%c0_2, %c0_3] : memref<56x128xf32, #tpu.memory_space<vmem>>, vector<16x10xf32>
    %c16 = arith.constant 16 : index
    %c0_4 = arith.constant 0 : index
    %3 = vector.load %arg2[%c16, %c0_4] : memref<56x128xf32, #tpu.memory_space<vmem>>, vector<10x20xf32>
    %c32 = arith.constant 32 : index
    %c0_5 = arith.constant 0 : index
    %4 = vector.load %arg2[%c32, %c0_5] : memref<56x128xf32, #tpu.memory_space<vmem>>, vector<1x20xf32>
    %c40 = arith.constant 40 : index
    %c0_6 = arith.constant 0 : index
    %5 = vector.load %arg2[%c40, %c0_6] : memref<56x128xf32, #tpu.memory_space<vmem>>, vector<1x10xf32>
    %c41 = arith.constant 41 : index
    %c0_7 = arith.constant 0 : index
    %6 = vector.load %arg2[%c41, %c0_7] : memref<56x128xf32, #tpu.memory_space<vmem>>, vector<1x10xf32>
    %c42 = arith.constant 42 : index
    %c0_8 = arith.constant 0 : index
    %7 = vector.load %arg2[%c42, %c0_8] : memref<56x128xf32, #tpu.memory_space<vmem>>, vector<1x10xf32>
    %c43 = arith.constant 43 : index
    %c0_9 = arith.constant 0 : index
    %8 = vector.load %arg2[%c43, %c0_9] : memref<56x128xf32, #tpu.memory_space<vmem>>, vector<1x20xf32>
    %c44 = arith.constant 44 : index
    %c0_10 = arith.constant 0 : index
    %9 = vector.load %arg2[%c44, %c0_10] : memref<56x128xf32, #tpu.memory_space<vmem>>, vector<1x20xf32>
    %c45 = arith.constant 45 : index
    %c0_11 = arith.constant 0 : index
    %10 = vector.load %arg2[%c45, %c0_11] : memref<56x128xf32, #tpu.memory_space<vmem>>, vector<1x20xf32>
    %c46 = arith.constant 46 : index
    %c0_12 = arith.constant 0 : index
    %11 = vector.load %arg2[%c46, %c0_12] : memref<56x128xf32, #tpu.memory_space<vmem>>, vector<1x1xf32>
    %c47 = arith.constant 47 : index
    %c0_13 = arith.constant 0 : index
    %12 = vector.load %arg2[%c47, %c0_13] : memref<56x128xf32, #tpu.memory_space<vmem>>, vector<1x1xf32>
    %c48 = arith.constant 48 : index
    %c0_14 = arith.constant 0 : index
    %13 = vector.load %arg2[%c48, %c0_14] : memref<56x128xf32, #tpu.memory_space<vmem>>, vector<1x1xf32>
    %cst = arith.constant dense<0.000000e+00> : vector<8x10xf32>
    %14 = tpu.matmul %1, %2, %cst {dimension_numbers = #tpu.dot_dimension_numbers<[1], [0], [0], [1], [0, 0, 1, 1], [], []>} : vector<8x16xf32>, vector<16x10xf32>, vector<8x10xf32> -> vector<8x10xf32>
    %15 = vector.broadcast %5 : vector<1x10xf32> to vector<8x10xf32>
    %16 = arith.addf %14, %15 : vector<8x10xf32>
    %cst_15 = arith.constant 0.000000e+00 : f32
    %17 = vector.broadcast %cst_15 : f32 to vector<8x10xf32>
    %18 = arith.maximumf %16, %17 : vector<8x10xf32>
    %cst_16 = arith.constant dense<0.000000e+00> : vector<10xf32>
    %19 = vector.multi_reduction <add>, %18, %cst_16 [0] : vector<8x10xf32> to vector<10xf32>
    %20 = vector.shape_cast %19 : vector<10xf32> to vector<1x10xf32>
    %cst_17 = arith.constant 8.000000e+00 : f32
    %21 = vector.broadcast %cst_17 : f32 to vector<1x10xf32>
    %22 = arith.divf %20, %21 : vector<1x10xf32>
    %23 = arith.mulf %18, %18 : vector<8x10xf32>
    %cst_18 = arith.constant dense<0.000000e+00> : vector<10xf32>
    %24 = vector.multi_reduction <add>, %23, %cst_18 [0] : vector<8x10xf32> to vector<10xf32>
    %25 = vector.shape_cast %24 : vector<10xf32> to vector<1x10xf32>
    %cst_19 = arith.constant 8.000000e+00 : f32
    %26 = vector.broadcast %cst_19 : f32 to vector<1x10xf32>
    %27 = arith.divf %25, %26 : vector<1x10xf32>
    %28 = arith.mulf %22, %22 : vector<1x10xf32>
    %29 = arith.subf %27, %28 : vector<1x10xf32>
    %cst_20 = arith.constant 0.000000e+00 : f32
    %30 = vector.broadcast %cst_20 : f32 to vector<1x10xf32>
    %31 = arith.maximumf %29, %30 : vector<1x10xf32>
    %cst_21 = arith.constant 9.99999974E-6 : f32
    %32 = vector.broadcast %cst_21 : f32 to vector<1x10xf32>
    %33 = arith.addf %31, %32 : vector<1x10xf32>
    %34 = math.rsqrt %33 : vector<1x10xf32>
    %35 = arith.mulf %6, %34 : vector<1x10xf32>
    %36 = arith.mulf %22, %35 : vector<1x10xf32>
    %37 = arith.subf %7, %36 : vector<1x10xf32>
    %38 = vector.broadcast %35 : vector<1x10xf32> to vector<8x10xf32>
    %39 = arith.mulf %18, %38 : vector<8x10xf32>
    %40 = vector.broadcast %37 : vector<1x10xf32> to vector<8x10xf32>
    %41 = arith.addf %39, %40 : vector<8x10xf32>
    %cst_22 = arith.constant dense<0.000000e+00> : vector<8x20xf32>
    %42 = tpu.matmul %41, %3, %cst_22 {dimension_numbers = #tpu.dot_dimension_numbers<[1], [0], [0], [1], [0, 0, 1, 1], [], []>} : vector<8x10xf32>, vector<10x20xf32>, vector<8x20xf32> -> vector<8x20xf32>
    %43 = vector.broadcast %8 : vector<1x20xf32> to vector<8x20xf32>
    %44 = arith.addf %42, %43 : vector<8x20xf32>
    %cst_23 = arith.constant 0.000000e+00 : f32
    %45 = vector.broadcast %cst_23 : f32 to vector<8x20xf32>
    %46 = arith.maximumf %44, %45 : vector<8x20xf32>
    %cst_24 = arith.constant dense<0.000000e+00> : vector<20xf32>
    %47 = vector.multi_reduction <add>, %46, %cst_24 [0] : vector<8x20xf32> to vector<20xf32>
    %48 = vector.shape_cast %47 : vector<20xf32> to vector<1x20xf32>
    %cst_25 = arith.constant 8.000000e+00 : f32
    %49 = vector.broadcast %cst_25 : f32 to vector<1x20xf32>
    %50 = arith.divf %48, %49 : vector<1x20xf32>
    %51 = arith.mulf %46, %46 : vector<8x20xf32>
    %cst_26 = arith.constant dense<0.000000e+00> : vector<20xf32>
    %52 = vector.multi_reduction <add>, %51, %cst_26 [0] : vector<8x20xf32> to vector<20xf32>
    %53 = vector.shape_cast %52 : vector<20xf32> to vector<1x20xf32>
    %cst_27 = arith.constant 8.000000e+00 : f32
    %54 = vector.broadcast %cst_27 : f32 to vector<1x20xf32>
    %55 = arith.divf %53, %54 : vector<1x20xf32>
    %56 = arith.mulf %50, %50 : vector<1x20xf32>
    %57 = arith.subf %55, %56 : vector<1x20xf32>
    %cst_28 = arith.constant 0.000000e+00 : f32
    %58 = vector.broadcast %cst_28 : f32 to vector<1x20xf32>
    %59 = arith.maximumf %57, %58 : vector<1x20xf32>
    %cst_29 = arith.constant 9.99999974E-6 : f32
    %60 = vector.broadcast %cst_29 : f32 to vector<1x20xf32>
    %61 = arith.addf %59, %60 : vector<1x20xf32>
    %62 = math.rsqrt %61 : vector<1x20xf32>
    %63 = arith.mulf %9, %62 : vector<1x20xf32>
    %64 = arith.mulf %50, %63 : vector<1x20xf32>
    %65 = arith.subf %10, %64 : vector<1x20xf32>
    %66 = vector.broadcast %63 : vector<1x20xf32> to vector<8x20xf32>
    %67 = arith.mulf %46, %66 : vector<8x20xf32>
    %68 = vector.broadcast %65 : vector<1x20xf32> to vector<8x20xf32>
    %69 = arith.addf %67, %68 : vector<8x20xf32>
    %70 = vector.broadcast %4 : vector<1x20xf32> to vector<8x20xf32>
    %71 = arith.mulf %69, %70 : vector<8x20xf32>
    %cst_30 = arith.constant dense<0.000000e+00> : vector<8xf32>
    %72 = vector.multi_reduction <add>, %71, %cst_30 [1] : vector<8x20xf32> to vector<8xf32>
    %73 = vector.shape_cast %72 : vector<8xf32> to vector<8x1xf32>
    %74 = vector.broadcast %11 : vector<1x1xf32> to vector<8x1xf32>
    %75 = arith.addf %73, %74 : vector<8x1xf32>
    %cst_31 = arith.constant 0.000000e+00 : f32
    %76 = vector.broadcast %cst_31 : f32 to vector<8x1xf32>
    %77 = arith.maximumf %75, %76 : vector<8x1xf32>
    %cst_32 = arith.constant dense<0.000000e+00> : vector<1xf32>
    %78 = vector.multi_reduction <add>, %77, %cst_32 [0] : vector<8x1xf32> to vector<1xf32>
    %79 = vector.shape_cast %78 : vector<1xf32> to vector<1x1xf32>
    %cst_33 = arith.constant 8.000000e+00 : f32
    %80 = vector.broadcast %cst_33 : f32 to vector<1x1xf32>
    %81 = arith.divf %79, %80 : vector<1x1xf32>
    %82 = arith.mulf %77, %77 : vector<8x1xf32>
    %cst_34 = arith.constant dense<0.000000e+00> : vector<1xf32>
    %83 = vector.multi_reduction <add>, %82, %cst_34 [0] : vector<8x1xf32> to vector<1xf32>
    %84 = vector.shape_cast %83 : vector<1xf32> to vector<1x1xf32>
    %cst_35 = arith.constant 8.000000e+00 : f32
    %85 = vector.broadcast %cst_35 : f32 to vector<1x1xf32>
    %86 = arith.divf %84, %85 : vector<1x1xf32>
    %87 = arith.mulf %81, %81 : vector<1x1xf32>
    %88 = arith.subf %86, %87 : vector<1x1xf32>
    %cst_36 = arith.constant 0.000000e+00 : f32
    %89 = vector.broadcast %cst_36 : f32 to vector<1x1xf32>
    %90 = arith.maximumf %88, %89 : vector<1x1xf32>
    %cst_37 = arith.constant 9.99999974E-6 : f32
    %91 = vector.broadcast %cst_37 : f32 to vector<1x1xf32>
    %92 = arith.addf %90, %91 : vector<1x1xf32>
    %93 = math.rsqrt %92 : vector<1x1xf32>
    %94 = arith.mulf %12, %93 : vector<1x1xf32>
    %95 = arith.mulf %81, %94 : vector<1x1xf32>
    %96 = arith.subf %13, %95 : vector<1x1xf32>
    %97 = vector.broadcast %94 : vector<1x1xf32> to vector<8x1xf32>
    %98 = arith.mulf %77, %97 : vector<8x1xf32>
    %99 = vector.broadcast %96 : vector<1x1xf32> to vector<8x1xf32>
    %100 = arith.addf %98, %99 : vector<8x1xf32>
    %c0_38 = arith.constant 0 : index
    %c0_39 = arith.constant 0 : index
    %c0_40 = arith.constant 0 : index
    %101 = vector.load %arg3[%c0_38, %c0_39, %c0_40] : memref<1x8x1xf32, #tpu.memory_space<vmem>>, vector<1x8x1xf32>
    %102 = vector.shape_cast %101 : vector<1x8x1xf32> to vector<8x1xf32>
    %103 = vector.shape_cast %100 : vector<8x1xf32> to vector<1x8x1xf32>
    tpu.vector_store %arg3[%c0_38, %c0_39, %c0_40], %103 {strides = array<i32>} : memref<1x8x1xf32, #tpu.memory_space<vmem>>, vector<1x8x1xf32>,
    return
  }
  func.func @transform_0(%arg0: i32) -> (i32, i32, i32) {
    %c0_i32 = arith.constant 0 : i32
    %c0_i32_0 = arith.constant 0 : i32
    %c0_i32_1 = arith.constant 0 : i32
    return %arg0, %c0_i32, %c0_i32_0 : i32, i32, i32
  }
  func.func @transform_1(%arg0: i32) -> (i32, i32) {
    %c0_i32 = arith.constant 0 : i32
    %c0_i32_0 = arith.constant 0 : i32
    %c0_i32_1 = arith.constant 0 : i32
    return %c0_i32, %c0_i32_0 : i32, i32
  }
  func.func @transform_2(%arg0: i32) -> (i32, i32, i32) {
    %c0_i32 = arith.constant 0 : i32
    %c0_i32_0 = arith.constant 0 : i32
    %c0_i32_1 = arith.constant 0 : i32
    return %arg0, %c0_i32, %c0_i32_0 : i32, i32, i32
  }
}

</mosaic_0001>

<bundles_post_ra>
// kernel: tpu_custom_call.1
= control target key start
LH: loop header
LB: loop body
LE: loop exit
PB: predicated region body
PF: predicated region fallthrough
CT: control target
= control target key end

     0   :  { %7 = vsyncpa [#allocation3], 0  ;;  %s775_s0 = inlined_call_operand.hbm [shape: f32[4,8,16], index: 0, kind: input, shape index: {}]   ;;  %s776_s1 = inlined_call_operand.hbm [shape: f32[56,128], index: 1, kind: input, shape index: {}]   ;;  %s777_s2 = inlined_call_operand.vmem [shape: f32[4,8,1], index: 2, kind: output, shape index: {}]  }
   0x1   :  { %9 = vsyncpa [#allocation3 + $0x1], 0 }
   0x2   :  { %10 = vsyncpa [#allocation5], 0  ;;  %s655_s9 = smov 0   ;;  %s657_s10 = smov 0  }
   0x3   :  { %s659_s11 = smov 0   ;;  %s661_s12 = smov 0  }
   0x4 LB: > { %s105_s15 = sshll.u32 %s776_s1, 4  ;;  %s677_s16 = sadd.s32 4294967295, %s634_s12   ;;  %s634_s12 = sphi %s661_s12, %s784_s12   ;;  %s630_s11 = sphi %s659_s11, %s783_s11   ;;  %s626_s10 = sphi %s657_s10, %s782_s10   ;;  %s622_s9 = sphi %s655_s9, %s781_s9   ;;  %s106_s15 = int_to_ptr.hbm [resolvable:$true] %s105_s15 }
   0x5   : > { %p457_p0 = scmp.ge.s32.totalorder %s634_s12, 1  ;;  %p37_p1 = scmp.eq.s32.totalorder %s677_s16, 0 }
   0x6   : > { %p94_p2 = scmp.lt.s32.totalorder %s634_s12, 5  ;;  %s636_s18 = smov [#allocation4]  }
   0x7   : > { %s107_s19 = sshll.u32 %s636_s18, 4  ;;  %s637_s20 = smov 128   ;;  %s108_s19 = int_to_ptr.vmem [resolvable:$true] %s107_s19 }
   0x8   : > { %p682_p3 = pnand %p457_p0, %p94_p2  ;;  %s638_s21 = smov 8  }
   0x9   : > { %s691_s22 = sadd.s32 1, %s634_s12   ;;  %s23_s24 = sadd.s32 1, %s630_s11 }
   0xa   : > { %p477_p4 = pneg %p682_p3  ;;  %s20_s23 = ssub.s32 %s634_s12, %s691_s22 }
   0xb   : > { %p21_p6 = scmp.eq.s32.totalorder %s20_s23, 0  ;;  %p30_p7 = scmp.ne.s32.totalorder %s630_s11, %s626_s10 }
   0xc   : > { %p478_p5 = pnand %p477_p4, %p37_p1  ;;  %p31_p8 = scmp.eq.s32.totalorder %s634_s12, 0 }
   0xd   : > { %p36_p9 = scmp.ne.s32.totalorder %s626_s10, %s622_s9  ;;  %p486_p12 = scmp.lt.s32.totalorder %s634_s12, 4 }
   0xe   : > { %480 = dma.hbm_to_vmem [thread:$0]  (!%p478_p5), %s106_s15, 896, %s108_s19, [#allocation5], %s637_s20, %s637_s20, %s638_s21  }
   0xf   : > { %s701_s25 = scalar_select %p21_p6, %s630_s11, %s23_s24  }
  0x10   : > { %p32_p10 = por %p31_p8, %p30_p7  ;;  %p705_p11 = por %p37_p1, %p36_p9 }
  0x11   : > { %s121_s27 = sand.u32 1, %s630_s11   ;;  %s461_s29 = sshll.u32 %s634_s12, 3 }
  0x12   : > { %s460_s28 = sshll.u32 %s121_s27, 3  ;;  %s129_s4 = scalar_lea.hbm %s775_s0, %s461_s29 }
  0x13   : > { %s125_s5 = scalar_lea.vmem [#allocation2], %s460_s28  ;;  %s131_s7 = sshll.u32 %s129_s4, 4  ;;  %s132_s7 = int_to_ptr.hbm [resolvable:$true] %s131_s7 }
  0x14   : > { %s133_s6 = sshll.u32 %s125_s5, 4  ;;  %p715_p13 = pnand %p486_p12, %p32_p10  ;;  %s134_s6 = int_to_ptr.vmem [resolvable:$true] %s133_s6 }
  0x15   : > { %s122_s9 = scalar_lea.sflag [#allocation3], %s121_s27  ;;  %s566_s13 = sshra.s32 %s132_s7, 4  ;;  %s567_s13 = int_to_ptr.hbm [resolvable:$true] %s566_s13 }
  0x16   : > { %s568_s14 = scalar_lea.hbm %s567_s13, 8  ;;  %p570_p2 = pneg %p715_p13 }
  0x17   : > { %p569_p0 = scmp.ne.s32.totalorder %s567_s13, %s568_s14  ;;  %s573_s18 = scalar_lea.hbm %s775_s0, 32 }
  0x18   : > { %p574_p6 = scmp.lt.s32.totalorder %s567_s13, %s775_s0  ;;  %p575_p7 = scmp.lt.s32.totalorder %s573_s18, %s568_s14 }
  0x19   : > { %p571_p4 = pnand %p570_p2, %p569_p0 }
  0x1a   : > { %p576_p8 = por %p575_p7, %p574_p6 }
  0x1b   : > { %p572_p5 = pneg %p571_p4 }
  0x1d   : > { %p577_p9 = pnand %p576_p8, %p572_p5 }
  0x1f   : > { %580 = shalt.err (!%p577_p9)
}
  0x20   : > { %484 = dma.hbm_to_vmem [thread:$0]  (!%p715_p13), %s132_s7, 128, %s134_s6, %s122_s9  }
  0x21   : > { %142 = sbr.rel (%p682_p3) target bundleno = 582 (0x246), region = 28  ;;  %s144_s21 = sand.u32 (!%p682_p3), 1, %s626_s10  }
  0x22   : > { %s463_s23 = sshll.u32 (!%p682_p3), %s144_s21, 3  ;;  %s145_s24 = scalar_lea.sflag (!%p682_p3), [#allocation3], %s144_s21 }
  0x23   : > { %s148_s27 = scalar_lea.vmem (!%p682_p3), [#allocation2], %s463_s23 }
  0x26   : > { %613 = dma.done.wait (%p705_p11), %s145_s24, 128  }
  0x27   : > { %615 = vsyncadd (%p705_p11), %s145_s24, 4294967168 }
  0x28   : > { %617 = dma.done.wait (%p37_p1), [#allocation5], 896  }
  0x29   : > { %619 = vsyncadd (%p37_p1), [#allocation5], 4294966400  ;;  %v180_v0 = vld [vmem:[#allocation4 + $0x8] sm:$0xff]  ;;  %v179_v1 = vld [vmem:[#allocation4] sm:$0xff]  ;;  %vm194_vm0 = vcmask 130048   ;;  %vm269_vm1 = vcmask 1041408  }
  0x2a   : > { %212 = vmatpush.msra.mxu0 %v180_v0  ;;  %v178_v2 = vld [vmem:[%s148_s27] sm:$0xff]  ;;  %v639_v5 = vmov 8.0   ;;  %v524_v7 = vld [vmem:[#allocation4 + $0x28] ss:$0 sm:$0xff]  ;;  %vm219_vm2 = vcmask 80896   ;;  %vm294_vm7 = vcmask 162816  }
  0x2b   : > { %v182_v3 = vld [vmem:[#allocation4 + $0x18] sm:$0x3]  ;;  %v181_v4 = vld [vmem:[#allocation4 + $0x10] sm:$0xff]  ;;  %528 = vrcp.f32 %v639_v5  ;;  %v185_v42 = vld [vmem:[#allocation4 + $0x29] sm:$0x1]  ;;  %vm341_vm11 = vcmask 7168  }
  0x2c   : > { %213 = vmatpush.msra.mxu0 %v179_v1  ;;  %467 = vmatpush.msk.msra.mxu1 %vm269_vm1, %v182_v3  ;;  %v186_v46 = vld [vmem:[#allocation4 + $0x2a] sm:$0x1]  ;;  %v525_v53 = vld [vmem:[#allocation4 + $0x2b] ss:$0 sm:$0xff]  ;;  %p174_p1 = scmp.lt.s32.totalorder %s677_s16, 3 }
  0x2d   : > { %466 = vmatmul.msk.f32.vlgmr.msra.gmra.mxu0 %vm194_vm0, %v178_v2 }
  0x2e   : > { %288 = vmatpush.msra.mxu1 %v181_v4  ;;  %s786_s16 = smov (!%p174_p1, %s677_s16), 3 }
  0x2f   : > { %s465_s17 = sshll.u32 %s786_s16, 3 }
  0x30   : > { %s177_s29 = scalar_lea.vmem %s777_s2, %s465_s17 }
  0x31   : > { %v529_v6 = vpop.eup %528 }
  0x32   : > { %v228_v8 = vmul.f32 8.0, %v529_v6  ;;  %vm232_vm3 = vweird.f32 %v529_v6 }
  0x34   : > { %v229_v12 = vsub.f32 1.0, %v228_v8 }
  0x36   : > { %v230_v16 = vmul.f32 %v529_v6, %v229_v12 }
  0x38   : > { %v231_v22 = vadd.f32 %v529_v6, %v230_v16 }
  0x3a   : > { %v742_v27 = vsel %vm232_vm3, %v529_v6, %v231_v22 }
  0xaa   : > { %v215_v9 = vpop.f32.mrf.mxu0 }
  0xab   : > { %v216_v10 = vadd.f32 %v524_v7, %v215_v9 }
  0xad   : > { %v218_v11 = vmax.f32 %v216_v10, 0.0 }
  0xaf   : > { %v235_v13 = vmul.f32 %v218_v11, %v218_v11  ;;  %v220_v14 = vsel %vm219_vm2, %v218_v11, 0.0 }
  0xb0   : > { %v221_v15 = vrot.slane %v220_v14, 4 }
  0xb1   : > { %v236_v17 = vsel %vm219_vm2, %v235_v13, 0.0 }
  0xb2   : > { %v222_v18 = vadd.f32 %v221_v15, %v220_v14  ;;  %v237_v19 = vrot.slane %v236_v17, 4 }
  0xb4   : > { %v223_v20 = vrot.slane %v222_v18, 2  ;;  %v238_v21 = vadd.f32 %v237_v19, %v236_v17  ;;  %v188_v19 = vld [vmem:[#allocation4 + $0x2c] sm:$0x1] }
  0xb6   : > { %v224_v23 = vadd.f32 %v223_v20, %v222_v18  ;;  %v239_v24 = vrot.slane %v238_v21, 2 }
  0xb8   : > { %v225_v25 = vrot.slane %v224_v23, 1  ;;  %v240_v26 = vadd.f32 %v239_v24, %v238_v21 }
  0xba   : > { %v226_v28 = vadd.f32 %v225_v25, %v224_v23  ;;  %v241_v29 = vrot.slane %v240_v26, 1  ;;  %v189_v23 = vld [vmem:[#allocation4 + $0x2d] sm:$0x1] }
  0xbc   : > { %v234_v30 = vmul.f32 %v742_v27, %v226_v28  ;;  %v242_v31 = vadd.f32 %v241_v29, %v240_v26 }
  0xbe   : > { %v243_v32 = vmul.f32 %v242_v31, %v742_v27  ;;  %v244_v33 = vmul.f32 %v234_v30, %v234_v30 }
  0xc0   : > { %v245_v34 = vsub.f32 %v243_v32, %v244_v33 }
  0xc2   : > { %v246_v35 = vmax.f32 %v245_v34, 0.0  ;;  %v527_v34 = vld [vmem:[#allocation4 + $0x2e] ss:$0 sm:$0xff] }
  0xc4   : > { %v247_v36 = vadd.f32 1e-05, %v246_v35 }
  0xc6   : > { %530 = vrsqrt.f32 %v247_v36  ;;  %vm254_vm5 = vweird.f32 %v247_v36 }
  0xcc   : > { %v531_v37 = vpop.eup %530 }
  0xcd   : > { %v249_v38 = vmul.f32 %v531_v37, %v247_v36  ;;  %vm255_vm4 = vweird.f32 %v531_v37 }
  0xce   : > { %vm256_vm6 = vmor %vm254_vm5, %vm255_vm4 }
  0xcf   : > { %v250_v39 = vmul.f32 %v531_v37, %v249_v38 }
  0xd1   : > { %v251_v40 = vmul.f32 0.5, %v250_v39 }
  0xd3   : > { %v252_v41 = vsub.f32 1.5, %v251_v40 }
  0xd5   : > { %v253_v43 = vmul.f32 %v531_v37, %v252_v41 }
  0xd7   : > { %v257_v44 = vsel %vm256_vm6, %v531_v37, %v253_v43 }
  0xd8   : > { %v258_v45 = vmul.f32 %v257_v44, %v185_v42 }
  0xda   : > { %v259_v47 = vmul.f32 %v258_v45, %v234_v30  ;;  %v261_v48 = vperm.slane %v258_v45, 0  ;;  %v526_v30 = vld [vmem:[#allocation4 + $0x20] ss:$0 sm:$0xff] }
  0xdc   : > { %v260_v49 = vsub.f32 %v186_v46, %v259_v47  ;;  %v262_v50 = vmul.f32 %v261_v48, %v218_v11 }
  0xde   : > { %v263_v51 = vperm.slane %v260_v49, 0 }
  0xe0   : > { %v264_v52 = vadd.f32 %v263_v51, %v262_v50 }
  0xe2   : > { %468 = vmatmul.msk.f32.vlgmr.msra.gmra.mxu1 %vm219_vm2, %v264_v52 }
 0x15f   : > { %v290_v54 = vpop.f32.mrf.mxu1 }
 0x160   : > { %v291_v55 = vadd.f32 %v525_v53, %v290_v54 }
 0x162   : > { %v293_v56 = vmax.f32 %v291_v55, 0.0 }
 0x164   : > { %v303_v57 = vmul.f32 %v293_v56, %v293_v56  ;;  %v295_v58 = vsel %vm294_vm7, %v293_v56, 0.0 }
 0x165   : > { %v296_v59 = vrot.slane %v295_v58, 4 }
 0x166   : > { %v304_v60 = vsel %vm294_vm7, %v303_v57, 0.0 }
 0x167   : > { %v297_v61 = vadd.f32 %v296_v59, %v295_v58  ;;  %v305_v62 = vrot.slane %v304_v60, 4 }
 0x169   : > { %v298_v63 = vrot.slane %v297_v61, 2  ;;  %v306_v0 = vadd.f32 %v305_v62, %v304_v60 }
 0x16b   : > { %v299_v1 = vadd.f32 %v298_v63, %v297_v61  ;;  %v307_v2 = vrot.slane %v306_v0, 2 }
 0x16d   : > { %v300_v3 = vrot.slane %v299_v1, 1  ;;  %v308_v4 = vadd.f32 %v307_v2, %v306_v0  ;;  %v191_v0 = vld [vmem:[#allocation4 + $0x2f] sm:$0x1] }
 0x16f   : > { %v301_v5 = vadd.f32 %v300_v3, %v299_v1  ;;  %v309_v6 = vrot.slane %v308_v4, 1  ;;  %v192_v3 = vld [vmem:[#allocation4 + $0x30] sm:$0x1] }
 0x171   : > { %v302_v7 = vmul.f32 %v301_v5, %v742_v27  ;;  %v310_v8 = vadd.f32 %v309_v6, %v308_v4 }
 0x173   : > { %v311_v9 = vmul.f32 %v310_v8, %v742_v27  ;;  %v312_v10 = vmul.f32 %v302_v7, %v302_v7 }
 0x175   : > { %v313_v11 = vsub.f32 %v311_v9, %v312_v10 }
 0x177   : > { %v314_v12 = vmax.f32 %v313_v11, 0.0 }
 0x179   : > { %v315_v13 = vadd.f32 1e-05, %v314_v12 }
 0x17b   : > { %532 = vrsqrt.f32 %v315_v13  ;;  %vm322_vm9 = vweird.f32 %v315_v13 }
 0x181   : > { %v533_v14 = vpop.eup %532 }
 0x182   : > { %v317_v15 = vmul.f32 %v533_v14, %v315_v13  ;;  %vm323_vm8 = vweird.f32 %v533_v14 }
 0x183   : > { %vm324_vm10 = vmor %vm322_vm9, %vm323_vm8 }
 0x184   : > { %v318_v16 = vmul.f32 %v533_v14, %v317_v15 }
 0x186   : > { %v319_v17 = vmul.f32 0.5, %v318_v16 }
 0x188   : > { %v320_v18 = vsub.f32 1.5, %v319_v17 }
 0x18a   : > { %v321_v20 = vmul.f32 %v533_v14, %v320_v18 }
 0x18c   : > { %v325_v21 = vsel %vm324_vm10, %v533_v14, %v321_v20 }
 0x18d   : > { %v326_v22 = vmul.f32 %v325_v21, %v188_v19 }
 0x18f   : > { %v327_v24 = vmul.f32 %v326_v22, %v302_v7  ;;  %v329_v25 = vperm.slane %v326_v22, 0 }
 0x191   : > { %v328_v26 = vsub.f32 %v189_v23, %v327_v24  ;;  %v330_v28 = vmul.f32 %v329_v25, %v293_v56 }
 0x193   : > { %v331_v29 = vperm.slane %v328_v26, 0 }
 0x195   : > { %v332_v31 = vadd.f32 %v331_v29, %v330_v28 }
 0x197   : > { %v334_v32 = vmul.f32 %v526_v30, %v332_v31 }
 0x199   : > { %v335_v33 = vsel %vm294_vm7, %v334_v32, 0.0 }
 0x19a   : > { %336 = vadd.xlane.f32.xlu0 %v335_v33 }
 0x20d   : > { %v337_v35 = vpop.xlane.xlu0 %336 }
 0x20e   : > { %v339_v36 = vadd.f32 %v527_v34, %v337_v35 }
 0x210   : > { %v340_v37 = vmax.f32 %v339_v36, 0.0 }
 0x212   : > { %v342_v38 = vsel %vm341_vm11, %v340_v37, 0.0  ;;  %v350_v39 = vmul.f32 %v340_v37, %v340_v37 }
 0x213   : > { %v343_v40 = vrot.slane %v342_v38, 4 }
 0x214   : > { %v351_v41 = vsel %vm341_vm11, %v350_v39, 0.0 }
 0x215   : > { %v344_v42 = vadd.f32 %v343_v40, %v342_v38  ;;  %v352_v43 = vrot.slane %v351_v41, 4 }
 0x217   : > { %v345_v44 = vrot.slane %v344_v42, 2  ;;  %v353_v45 = vadd.f32 %v352_v43, %v351_v41 }
 0x219   : > { %v346_v46 = vadd.f32 %v345_v44, %v344_v42  ;;  %v354_v47 = vrot.slane %v353_v45, 2 }
 0x21b   : > { %v347_v48 = vrot.slane %v346_v46, 1  ;;  %v355_v49 = vadd.f32 %v354_v47, %v353_v45 }
 0x21d   : > { %v348_v50 = vadd.f32 %v347_v48, %v346_v46  ;;  %v356_v51 = vrot.slane %v355_v49, 1 }
 0x21f   : > { %v349_v52 = vmul.f32 %v348_v50, %v742_v27  ;;  %v357_v53 = vadd.f32 %v356_v51, %v355_v49 }
 0x221   : > { %v358_v54 = vmul.f32 %v357_v53, %v742_v27  ;;  %v359_v55 = vmul.f32 %v349_v52, %v349_v52 }
 0x223   : > { %v360_v56 = vsub.f32 %v358_v54, %v359_v55 }
 0x225   : > { %v361_v57 = vmax.f32 %v360_v56, 0.0 }
 0x227   : > { %v362_v58 = vadd.f32 1e-05, %v361_v57 }
 0x229   : > { %534 = vrsqrt.f32 %v362_v58  ;;  %vm369_vm13 = vweird.f32 %v362_v58 }
 0x22f   : > { %v535_v59 = vpop.eup %534 }
 0x230   : > { %v364_v60 = vmul.f32 %v535_v59, %v362_v58  ;;  %vm370_vm12 = vweird.f32 %v535_v59 }
 0x231   : > { %vm371_vm14 = vmor %vm369_vm13, %vm370_vm12 }
 0x232   : > { %v365_v61 = vmul.f32 %v535_v59, %v364_v60 }
 0x234   : > { %v366_v62 = vmul.f32 0.5, %v365_v61 }
 0x236   : > { %v367_v63 = vsub.f32 1.5, %v366_v62 }
 0x238   : > { %v368_v1 = vmul.f32 %v535_v59, %v367_v63 }
 0x23a   : > { %v372_v2 = vsel %vm371_vm14, %v535_v59, %v368_v1 }
 0x23b   : > { %v373_v27 = vmul.f32 %v372_v2, %v191_v0 }
 0x23d   : > { %v374_v4 = vmul.f32 %v373_v27, %v349_v52  ;;  %v376_v5 = vperm.slane %v373_v27, 0 }
 0x23f   : > { %v375_v6 = vsub.f32 %v192_v3, %v374_v4  ;;  %v377_v7 = vmul.f32 %v376_v5, %v340_v37 }
 0x241   : > { %v378_v8 = vperm.slane %v375_v6, 0 }
 0x243   : > { %v379_v9 = vadd.f32 %v378_v8, %v377_v7 }
 0x245   : > { %380 = vst.msk [vmem:[%s177_s29] sm:$0xff] %vm341_vm11, %v379_v9 }
 0x246 PF: > { %p13_p3 = scmp.ge.s32.totalorder %s691_s22, 6   ;;  %s781_s9 = smov %s626_s10 }
 0x247   : > { %s782_s10 = smov %s630_s11  ;;  %s783_s11 = smov %s701_s25 }
 0x248   : > { %s784_s12 = smov %s691_s22  ;;  %15 = sbr.rel (!%p13_p3) target bundleno = 4 (0x4), region = 72 }
 0x24d   :  { %400 = vsyncpa [#allocation3], 1 }
 0x24e   :  { %402 = vsyncpa [#allocation3 + $0x1], 1 }
 0x24f   :  { %403 = vsyncpa [#allocation5], 1 }

</bundles_post_ra>
